<compile_context>
chip_gen: v7x
topology: tpu7x:2x2x1
jax: 0.10.0
libtpu: 0.0.40
codegen_flags: <defaults>
</compile_context>

<pallas_src>
import functools

import jax
import jax.numpy as jnp
from jax import lax
from jax.experimental import pallas as pl
from jax.experimental.pallas import tpu as pltpu


def _round_up(x: int, m: int) -> int:
    return ((x + m - 1) // m) * m


def _sublane(dtype) -> int:
    """Minimum sublane tile for a dtype (f32 -> 8, bf16 -> 16, int8 -> 32)."""
    itemsize = jnp.dtype(dtype).itemsize
    return max(8, 32 // itemsize)


def _pick_tile(dim: int, align: int, cap: int) -> int:
    """Largest multiple of `align` that is <= cap and divides round_up(dim, align).

    Guarantees the grid covers the (alignment-rounded) dim exactly, so no
    tile-cap-induced zero padding / extra grid steps / extra DMA traffic.
    """
    padded = _round_up(dim, align)
    cap = max(align, (cap // align) * align)
    best = align
    t = align
    limit = min(cap, padded)
    while t <= limit:
        if padded % t == 0:
            best = t
        t += align
    return best


def _linear_kernel(x_ref, w_ref, b_ref, o_ref, acc_ref):
    """One (tm, tn) output tile; K-axis accumulation in an f32 VMEM scratch."""
    k = pl.program_id(2)

    @pl.when(k == 0)
    def _():
        acc_ref[...] = jnp.zeros_like(acc_ref)

    # x_ref: [tm, tk], w_ref: [tn, tk] (PyTorch nn.Linear layout).
    # Contract the last dim of both operands -> [tm, tn] on the MXU, f32 acc.
    # TODO(synk): verify in the Mosaic bundle dump that this transposed-RHS
    # contraction does not emit a per-tile vxpose; if it does, pre-transpose
    # the weight ONCE at init (outside the hot path), not per call.
    acc_ref[...] += lax.dot_general(
        x_ref[...],
        w_ref[...],
        dimension_numbers=(((1,), (1,)), ((), ())),
        preferred_element_type=jnp.float32,
    )

    @pl.when(k == pl.num_programs(2) - 1)
    def _():
        # Bias epilogue exactly once, on the last K step.
        o_ref[...] = (acc_ref[...] + b_ref[...].astype(jnp.float32)).astype(o_ref.dtype)


@functools.partial(jax.jit, static_argnames=("tm_max", "tn_max", "tk_max"))
def projection_layer(x, weight, bias, *, tm_max=512, tn_max=1024, tk_max=1024):
    """y = x @ weight.T + bias   (nn.Linear semantics).

    x:      [B, input_dim]
    weight: [output_dim, input_dim]   (PyTorch layout, used as-is -- no transpose)
    bias:   [output_dim]
    """
    B, K = x.shape
    N = weight.shape[0]

    sub = _sublane(x.dtype)
    # Tiles divide the alignment-rounded dims exactly (no cap-induced padding).
    tm = _pick_tile(B, sub, tm_max)
    tn = _pick_tile(N, 128, tn_max)
    tk = _pick_tile(K, 128, tk_max)

    m_pad = _round_up(B, tm)
    n_pad = _round_up(N, tn)
    k_pad = _round_up(K, tk)

    # Padding only happens for genuinely misaligned dims; for lane/sublane
    # aligned shapes (e.g. B=8, K=768, N=128) these are all no-ops.
    x_p = x if (m_pad == B and k_pad == K) else jnp.pad(
        x, ((0, m_pad - B), (0, k_pad - K)))
    w_p = weight if (n_pad == N and k_pad == K) else jnp.pad(
        weight, ((0, n_pad - N), (0, k_pad - K)))
    b_p = (bias if n_pad == N else jnp.pad(bias, (0, n_pad - N))).reshape(1, n_pad)

    grid = (m_pad // tm, n_pad // tn, k_pad // tk)

    # Explicit VMEM budget: double-buffered x/w/bias/out tiles + f32 accumulator,
    # plus slack; clamped to 48 MiB so v7x (64 MiB physical) never over-commits.
    in_bytes = jnp.dtype(x.dtype).itemsize
    out_bytes = jnp.dtype(x.dtype).itemsize
    working_set = (
        2 * tm * tk * in_bytes          # x tiles (double buffered)
        + 2 * tn * tk * in_bytes        # weight tiles
        + 2 * tn * in_bytes             # bias tiles
        + 2 * tm * tn * out_bytes       # output tiles
        + tm * tn * 4                   # f32 accumulator
    )
    vmem_limit = int(min(max(working_set * 5 // 4 + (2 << 20), 32 << 20), 48 << 20))

    out = pl.pallas_call(
        _linear_kernel,
        out_shape=jax.ShapeDtypeStruct((m_pad, n_pad), x.dtype),
        grid_spec=pltpu.PrefetchScalarGridSpec(
            num_scalar_prefetch=0,
            grid=grid,
            in_specs=[
                pl.BlockSpec((tm, tk), lambda i, j, k: (i, k)),   # x tile
                pl.BlockSpec((tn, tk), lambda i, j, k: (j, k)),   # weight tile (N,K layout)
                pl.BlockSpec((1, tn), lambda i, j, k: (0, j)),    # bias tile (resident over K)
            ],
            out_specs=pl.BlockSpec((tm, tn), lambda i, j, k: (i, j)),
            scratch_shapes=[pltpu.VMEM((tm, tn), jnp.float32)],
        ),
        compiler_params=pltpu.CompilerParams(
            dimension_semantics=("parallel", "parallel", "arbitrary"),
            vmem_limit_bytes=vmem_limit,
        ),
    )(x_p, w_p, b_p)

    if m_pad == B and n_pad == N:
        return out
    return out[:B, :N]


if __name__ == "__main__":
    # Shapes consistent with a DNABERT-style projection head:
    # batch=8, input_dim=768 (BERT hidden), output_dim=128.
    # With the new tiling this compiles to a single (1,1,1) grid step with
    # zero padding.
    B, input_dim, output_dim = 8, 768, 128

    key = jax.random.PRNGKey(0)
    k_x, k_w, k_b = jax.random.split(key, 3)

    x = jax.random.normal(k_x, (B, input_dim), dtype=jnp.float32)
    bound = 1.0 / (input_dim ** 0.5)
    weight = jax.random.uniform(
        k_w, (output_dim, input_dim), minval=-bound, maxval=bound, dtype=jnp.float32
    )
    bias = jax.random.uniform(
        k_b, (output_dim,), minval=-bound, maxval=bound, dtype=jnp.float32
    )

    y = projection_layer(x, weight, bias)
    y = jax.block_until_ready(y)

    # Reference check (same math as nn.Linear), high-precision XLA matmul.
    y_ref = (
        jnp.einsum("bk,nk->bn", x, weight, precision=lax.Precision.HIGHEST) + bias
    )
    assert y.shape == (B, output_dim)
    assert jnp.allclose(y, y_ref, atol=1e-3, rtol=1e-3), float(
        jnp.max(jnp.abs(y - y_ref))
    )

    print("KERNEL_OK")
</pallas_src>

<mosaic_0001>
module attributes {stable_mosaic.version = 11 : i64} {
  func.func @_linear_kernel(%arg0: i32, %arg1: i32, %arg2: i32, %arg3: memref<8x768xf32, #tpu.memory_space<vmem>>, %arg4: memref<128x768xf32, #tpu.memory_space<vmem>>, %arg5: memref<1x128xf32, #tpu.memory_space<vmem>>, %arg6: memref<8x128xf32, #tpu.memory_space<vmem>>, %arg7: memref<8x128xf32, #tpu.memory_space<vmem>>) attributes {dimension_semantics = [#tpu.dimension_semantics<parallel>, #tpu.dimension_semantics<parallel>, #tpu.dimension_semantics<arbitrary>], iteration_bounds = array<i64: 1, 1, 1>, scalar_prefetch = 0 : i64, scratch_operands = 1 : i64, tpu.core_type = #tpu.core_type<tc>, window_params = [{transform_indices = @transform_0, window_bounds = array<i64: 8, 768>}, {transform_indices = @transform_1, window_bounds = array<i64: 128, 768>}, {transform_indices = @transform_2, window_bounds = array<i64: 1, 128>}, {transform_indices = @transform_3, window_bounds = array<i64: 8, 128>}]} {
    %c0_i32 = arith.constant 0 : i32
    %0 = arith.cmpi eq, %arg2, %c0_i32 : i32
    %1 = arith.extui %0 : i1 to i32
    %c0_i32_0 = arith.constant 0 : i32
    %2 = arith.cmpi ne, %1, %c0_i32_0 : i32
    scf.if %2 {
      %cst_10 = arith.constant 0.000000e+00 : f32
      %12 = vector.broadcast %cst_10 : f32 to vector<8x128xf32>
      %c0_11 = arith.constant 0 : index
      %c0_12 = arith.constant 0 : index
      %13 = vector.load %arg7[%c0_11, %c0_12] : memref<8x128xf32, #tpu.memory_space<vmem>>, vector<8x128xf32>
      tpu.vector_store %arg7[%c0_11, %c0_12], %12 {strides = array<i32>} : memref<8x128xf32, #tpu.memory_space<vmem>>, vector<8x128xf32>,
    } else {
    }
    %c0 = arith.constant 0 : index
    %c0_1 = arith.constant 0 : index
    %3 = vector.load %arg7[%c0, %c0_1] : memref<8x128xf32, #tpu.memory_space<vmem>>, vector<8x128xf32>
    %c0_2 = arith.constant 0 : index
    %c0_3 = arith.constant 0 : index
    %4 = vector.load %arg3[%c0_2, %c0_3] : memref<8x768xf32, #tpu.memory_space<vmem>>, vector<8x768xf32>
    %c0_4 = arith.constant 0 : index
    %c0_5 = arith.constant 0 : index
    %5 = vector.load %arg4[%c0_4, %c0_5] : memref<128x768xf32, #tpu.memory_space<vmem>>, vector<128x768xf32>
    %cst = arith.constant dense<0.000000e+00> : vector<8x128xf32>
    %6 = tpu.matmul %4, %5, %cst {dimension_numbers = #tpu.dot_dimension_numbers<[1], [1], [0], [0], [0, 0, 1, 0], [], []>} : vector<8x768xf32>, vector<128x768xf32>, vector<8x128xf32> -> vector<8x128xf32>
    %7 = arith.addf %3, %6 : vector<8x128xf32>
    %c0_6 = arith.constant 0 : index
    %c0_7 = arith.constant 0 : index
    %8 = vector.load %arg7[%c0_6, %c0_7] : memref<8x128xf32, #tpu.memory_space<vmem>>, vector<8x128xf32>
    tpu.vector_store %arg7[%c0_6, %c0_7], %7 {strides = array<i32>} : memref<8x128xf32, #tpu.memory_space<vmem>>, vector<8x128xf32>,
    %c0_i32_8 = arith.constant 0 : i32
    %9 = arith.cmpi eq, %arg2, %c0_i32_8 : i32
    %10 = arith.extui %9 : i1 to i32
    %c0_i32_9 = arith.constant 0 : i32
    %11 = arith.cmpi ne, %10, %c0_i32_9 : i32
    scf.if %11 {
      %c0_10 = arith.constant 0 : index
      %c0_11 = arith.constant 0 : index
      %12 = vector.load %arg7[%c0_10, %c0_11] : memref<8x128xf32, #tpu.memory_space<vmem>>, vector<8x128xf32>
      %c0_12 = arith.constant 0 : index
      %c0_13 = arith.constant 0 : index
      %13 = vector.load %arg5[%c0_12, %c0_13] : memref<1x128xf32, #tpu.memory_space<vmem>>, vector<1x128xf32>
      %14 = vector.broadcast %13 : vector<1x128xf32> to vector<8x128xf32>
      %15 = arith.addf %12, %14 : vector<8x128xf32>
      %c0_14 = arith.constant 0 : index
      %c0_15 = arith.constant 0 : index
      %16 = vector.load %arg6[%c0_14, %c0_15] : memref<8x128xf32, #tpu.memory_space<vmem>>, vector<8x128xf32>
      tpu.vector_store %arg6[%c0_14, %c0_15], %15 {strides = array<i32>} : memref<8x128xf32, #tpu.memory_space<vmem>>, vector<8x128xf32>,
    } else {
    }
    return
  }
  func.func @transform_0(%arg0: i32, %arg1: i32, %arg2: i32) -> (i32, i32) {
    %c0_i32 = arith.constant 0 : i32
    return %arg0, %arg2 : i32, i32
  }
  func.func @transform_1(%arg0: i32, %arg1: i32, %arg2: i32) -> (i32, i32) {
    %c0_i32 = arith.constant 0 : i32
    return %arg1, %arg2 : i32, i32
  }
  func.func @transform_2(%arg0: i32, %arg1: i32, %arg2: i32) -> (i32, i32) {
    %c0_i32 = arith.constant 0 : i32
    %c0_i32_0 = arith.constant 0 : i32
    return %c0_i32, %arg1 : i32, i32
  }
  func.func @transform_3(%arg0: i32, %arg1: i32, %arg2: i32) -> (i32, i32) {
    %c0_i32 = arith.constant 0 : i32
    return %arg0, %arg1 : i32, i32
  }
}

</mosaic_0001>

<bundles_post_ra>
// kernel: projection_layer.1
= control target key start
LH: loop header
LB: loop body
LE: loop exit
PB: predicated region body
PF: predicated region fallthrough
CT: control target
= control target key end

     0   :  { %8 = vsyncpa [#allocation4], 0  ;;  %s635_s0 = inlined_call_operand.hbm [shape: f32[8,768], index: 0, kind: input, shape index: {}]   ;;  %s636_s1 = inlined_call_operand.hbm [shape: f32[128,768], index: 1, kind: input, shape index: {}]   ;;  %s637_s2 = inlined_call_operand.vmem [shape: f32[1,128], index: 2, kind: input, shape index: {}]   ;;  %s638_s3 = inlined_call_operand.hbm [shape: f32[8,128], index: 3, kind: output, shape index: {}]  }
   0x1   :  { %9 = vsyncpa [#allocation7], 0 }
   0x2   :  { %10 = vsyncpa [#allocation5], 0  ;;  %s564_s12 = smov [#allocation3]   ;;  %s565_s14 = smov [#allocation6]  }
   0x3   :  { %s17_s13 = sshll.u32 %s564_s12, 4  ;;  %s26_s15 = sshll.u32 %s565_s14, 4  ;;  %s18_s13 = int_to_ptr.vmem [resolvable:$true] %s17_s13  ;;  %s589_s15 = int_to_ptr.vmem [resolvable:$true] %s26_s15 }
   0x4   :  { %s492_s18 = scalar_lea.hbm %s635_s0, 768 }
   0x5   :  { %p493_p0 = scmp.ne.s32.totalorder %s635_s0, %s492_s18  ;;  %p496_p1 = scmp.lt.u32.totalorder %s492_s18, %s635_s0 }
   0x7   :  { %p498_p2 = pnand %p496_p1, %p493_p0 }
   0x9   :  { %501 = shalt.err (!%p498_p2)
}
   0xa   :  { %s502_s23 = scalar_lea.vmem %s18_s13, 768  ;;  %p507_p4 = scmp.lt.s32.totalorder %s18_s13, %s18_s13 }
   0xb   :  { %p503_p3 = scmp.ne.s32.totalorder %s18_s13, %s502_s23  ;;  %p508_p5 = scmp.lt.s32.totalorder %s502_s23, %s502_s23 }
   0xd   :  { %p509_p6 = por %p508_p5, %p507_p4 }
   0xf   :  { %p510_p7 = pnand %p509_p6, %p503_p3 }
  0x11   :  { %513 = shalt.err (!%p510_p7)
}
  0x12   :  { %20 = dma.hbm_to_vmem [thread:$0]  %s635_s0, 768, %s18_s13, [#allocation4]  }
  0x13   :  { %s514_s28 = scalar_lea.hbm %s636_s1, 12288 }
  0x14   :  { %p515_p8 = scmp.ne.s32.totalorder %s636_s1, %s514_s28  ;;  %p518_p9 = scmp.lt.u32.totalorder %s514_s28, %s636_s1 }
  0x16   :  { %p520_p10 = pnand %p518_p9, %p515_p8 }
  0x18   :  { %523 = shalt.err (!%p520_p10)
}
  0x19   :  { %s524_s6 = scalar_lea.vmem %s589_s15, 12288  ;;  %p529_p12 = scmp.lt.s32.totalorder %s589_s15, %s589_s15 }
  0x1a   :  { %p525_p11 = scmp.ne.s32.totalorder %s589_s15, %s524_s6  ;;  %p530_p13 = scmp.lt.s32.totalorder %s524_s6, %s524_s6 }
  0x1c   :  { %p531_p0 = por %p530_p13, %p529_p12 }
  0x1e   :  { %p532_p1 = pnand %p531_p0, %p525_p11 }
  0x20   :  { %535 = shalt.err (!%p532_p1)
}
  0x21   :  { %s566_s0 = smov 768   ;;  %s567_s7 = smov 48  }
  0x22   :  { %32 = dma.hbm_to_vmem [thread:$0]  %s636_s1, 12288, %s589_s15, [#allocation7], %s566_s0, %s566_s0, %s567_s7  }
  0x23   :  { %558 = dma.done.wait [#allocation4], 768  }
  0x24   :  { %559 = vsyncadd [#allocation4], 4294966528 }
  0x25   :  { %560 = dma.done.wait [#allocation7], 12288  }
  0x26   :  { %561 = vsyncadd [#allocation7], 4294955008  ;;  %v54_v0 = vld [vmem:[#allocation6 + $0x8] sm:$0xff]  ;;  %v60_v1 = vld [vmem:[#allocation6 + $0x38] sm:$0xff]  ;;  %s568_s11 = smov [#allocation8]  }
  0x27   :  { %v53_v2 = vld [vmem:[#allocation6] sm:$0xff]  ;;  %v391_v3 = vpack.c.bf16 %v60_v1, %v54_v0  ;;  %v59_v4 = vld [vmem:[#allocation6 + $0x30] sm:$0xff]  ;;  %v56_v5 = vld [vmem:[#allocation6 + $0x18] sm:$0xff]  ;;  %s380_s12 = sshll.u32 %s568_s11, 4  ;;  %s381_s12 = int_to_ptr.vmem [resolvable:$true] %s380_s12 }
  0x28   :  { %v62_v6 = vld [vmem:[#allocation6 + $0x48] sm:$0xff]  ;;  %v393_v7 = vpack.c.bf16 %v59_v4, %v53_v2  ;;  %v55_v9 = vld [vmem:[#allocation6 + $0x10] sm:$0xff]  ;;  %v61_v10 = vld [vmem:[#allocation6 + $0x40] sm:$0xff]  ;;  %s536_s13 = scalar_lea.vmem %s381_s12, 128  ;;  %p541_p3 = scmp.lt.s32.totalorder %s381_s12, %s381_s12 }
  0x29   :  { %v423_v8 = vpack.c.bf16 %v62_v6, %v56_v5  ;;  %v66_v11 = vld [vmem:[#allocation6 + $0x68] sm:$0xff]  ;;  %392 = vmatprep.subr.bf16.mxu0 %v391_v3  ;;  %v425_v12 = vpack.c.bf16 %v61_v10, %v55_v9  ;;  %v72_v13 = vld [vmem:[#allocation6 + $0x98] sm:$0xff]  ;;  %v65_v17 = vld [vmem:[#allocation6 + $0x60] sm:$0xff]  ;;  %p537_p2 = scmp.ne.s32.totalorder %s381_s12, %s536_s13  ;;  %p542_p4 = scmp.lt.s32.totalorder %s536_s13, %s536_s13 }
  0x2a   :  { %394 = vmatpush1.bf16.xpose.msra.mxu0 %v393_v7  ;;  %v395_v14 = vpack.c.bf16 %v72_v13, %v66_v11  ;;  %v68_v15 = vld [vmem:[#allocation6 + $0x78] sm:$0xff]  ;;  %v74_v16 = vld [vmem:[#allocation6 + $0xa8] sm:$0xff]  ;;  %v71_v18 = vld [vmem:[#allocation6 + $0x90] sm:$0xff] }
  0x2b   :  { %424 = vmatprep.subr.bf16.mxu1 %v423_v8  ;;  %v427_v19 = vpack.c.bf16 %v74_v16, %v68_v15  ;;  %v67_v20 = vld [vmem:[#allocation6 + $0x70] sm:$0xff]  ;;  %v73_v21 = vld [vmem:[#allocation6 + $0xa0] sm:$0xff]  ;;  %v78_v22 = vld [vmem:[#allocation6 + $0xc8] sm:$0xff]  ;;  %v397_v26 = vpack.c.bf16 %v71_v18, %v65_v17  ;;  %p543_p5 = por %p542_p4, %p541_p3 }
  0x2c   :  { %426 = vmatpush1.bf16.xpose.msra.mxu1 %v425_v12  ;;  %396 = vmatprep.subr.bf16.mxu0 %v395_v14  ;;  %v84_v23 = vld [vmem:[#allocation6 + $0xf8] sm:$0xff]  ;;  %v86_v25 = vld [vmem:[#allocation6 + $0x108] sm:$0xff]  ;;  %v429_v27 = vpack.c.bf16 %v73_v21, %v67_v20  ;;  %v77_v30 = vld [vmem:[#allocation6 + $0xc0] sm:$0xff] }
  0x2d   :  { %428 = vmatprep.subr.bf16.mxu1 %v427_v19  ;;  %v80_v24 = vld [vmem:[#allocation6 + $0xd8] sm:$0xff]  ;;  %v399_v28 = vpack.c.bf16 %v84_v23, %v78_v22  ;;  %v83_v31 = vld [vmem:[#allocation6 + $0xf0] sm:$0xff]  ;;  %v85_v33 = vld [vmem:[#allocation6 + $0x100] sm:$0xff]  ;;  %p544_p6 = pnand %p543_p5, %p537_p2 }
  0x2e   :  { %v431_v29 = vpack.c.bf16 %v86_v25, %v80_v24  ;;  %v79_v32 = vld [vmem:[#allocation6 + $0xd0] sm:$0xff]  ;;  %v90_v34 = vld [vmem:[#allocation6 + $0x128] sm:$0xff]  ;;  %v96_v35 = vld [vmem:[#allocation6 + $0x158] sm:$0xff]  ;;  %v401_v38 = vpack.c.bf16 %v83_v31, %v77_v30 }
  0x2f   :  { %v92_v36 = vld [vmem:[#allocation6 + $0x138] sm:$0xff]  ;;  %v98_v37 = vld [vmem:[#allocation6 + $0x168] sm:$0xff]  ;;  %v433_v39 = vpack.c.bf16 %v85_v33, %v79_v32  ;;  %v403_v40 = vpack.c.bf16 %v96_v35, %v90_v34  ;;  %v89_v42 = vld [vmem:[#allocation6 + $0x120] sm:$0xff] }
  0x30   :  { %v435_v41 = vpack.c.bf16 %v98_v37, %v92_v36  ;;  %v95_v43 = vld [vmem:[#allocation6 + $0x150] sm:$0xff]  ;;  %v97_v45 = vld [vmem:[#allocation6 + $0x160] sm:$0xff]  ;;  %v48_v46 = vld [vmem:[#allocation3 + $0x8] sm:$0xff] }
  0x31   :  { %v91_v44 = vld [vmem:[#allocation6 + $0x130] sm:$0xff]  ;;  %v102_v47 = vld [vmem:[#allocation6 + $0x188] sm:$0xff]  ;;  %v108_v48 = vld [vmem:[#allocation6 + $0x1b8] sm:$0xff]  ;;  %213 = vmatprep.mubr.f32.mxu0 %v48_v46  ;;  %v405_v52 = vpack.c.bf16 %v95_v43, %v89_v42 }
  0x32   :  { %398 = vmatpush1.bf16.xpose.msra.mxu0 %v397_v26  ;;  %v50_v49 = vld [vmem:[#allocation3 + $0x18] sm:$0xff]  ;;  %v104_v50 = vld [vmem:[#allocation6 + $0x198] sm:$0xff]  ;;  %v437_v53 = vpack.c.bf16 %v97_v45, %v91_v44  ;;  %v407_v54 = vpack.c.bf16 %v108_v48, %v102_v47  ;;  %v101_v56 = vld [vmem:[#allocation6 + $0x180] sm:$0xff] }
  0x33   :  { %400 = vmatprep.subr.bf16.mxu0 %v399_v28  ;;  %v110_v51 = vld [vmem:[#allocation6 + $0x1c8] sm:$0xff]  ;;  %283 = vmatprep.mubr.f32.mxu1 %v50_v49  ;;  %v107_v57 = vld [vmem:[#allocation6 + $0x1b0] sm:$0xff]  ;;  %v109_v59 = vld [vmem:[#allocation6 + $0x1c0] sm:$0xff] }
  0x34   :  { %430 = vmatpush1.bf16.xpose.msra.mxu1 %v429_v27  ;;  %v439_v55 = vpack.c.bf16 %v110_v51, %v104_v50  ;;  %v103_v58 = vld [vmem:[#allocation6 + $0x190] sm:$0xff]  ;;  %v114_v60 = vld [vmem:[#allocation6 + $0x1e8] sm:$0xff]  ;;  %v120_v61 = vld [vmem:[#allocation6 + $0x218] sm:$0xff]  ;;  %v409_v0 = vpack.c.bf16 %v107_v57, %v101_v56 }
  0x35   :  { %432 = vmatprep.subr.bf16.mxu1 %v431_v29  ;;  %v116_v62 = vld [vmem:[#allocation6 + $0x1f8] sm:$0xff]  ;;  %v122_v63 = vld [vmem:[#allocation6 + $0x228] sm:$0xff]  ;;  %v441_v1 = vpack.c.bf16 %v109_v59, %v103_v58  ;;  %v411_v2 = vpack.c.bf16 %v120_v61, %v114_v60  ;;  %v113_v4 = vld [vmem:[#allocation6 + $0x1e0] sm:$0xff] }
  0x36   :  { %v443_v3 = vpack.c.bf16 %v122_v63, %v116_v62  ;;  %v119_v5 = vld [vmem:[#allocation6 + $0x210] sm:$0xff]  ;;  %v121_v7 = vld [vmem:[#allocation6 + $0x220] sm:$0xff]  ;;  %v126_v8 = vld [vmem:[#allocation6 + $0x248] sm:$0xff] }
  0x37   :  { %v115_v6 = vld [vmem:[#allocation6 + $0x1f0] sm:$0xff]  ;;  %v132_v9 = vld [vmem:[#allocation6 + $0x278] sm:$0xff]  ;;  %v134_v11 = vld [vmem:[#allocation6 + $0x288] sm:$0xff]  ;;  %v413_v12 = vpack.c.bf16 %v119_v5, %v113_v4 }
  0x38   :  { %v128_v10 = vld [vmem:[#allocation6 + $0x258] sm:$0xff]  ;;  %v445_v13 = vpack.c.bf16 %v121_v7, %v115_v6  ;;  %v415_v14 = vpack.c.bf16 %v132_v9, %v126_v8  ;;  %v125_v16 = vld [vmem:[#allocation6 + $0x240] sm:$0xff]  ;;  %v131_v17 = vld [vmem:[#allocation6 + $0x270] sm:$0xff] }
  0x39   :  { %v447_v15 = vpack.c.bf16 %v134_v11, %v128_v10  ;;  %v127_v18 = vld [vmem:[#allocation6 + $0x250] sm:$0xff]  ;;  %v133_v19 = vld [vmem:[#allocation6 + $0x280] sm:$0xff]  ;;  %v138_v20 = vld [vmem:[#allocation6 + $0x2a8] sm:$0xff]  ;;  %v417_v24 = vpack.c.bf16 %v131_v17, %v125_v16 }
  0x3a   :  { %402 = vmatpush1.bf16.xpose.msra.mxu0 %v401_v38  ;;  %v144_v21 = vld [vmem:[#allocation6 + $0x2d8] sm:$0xff]  ;;  %v146_v23 = vld [vmem:[#allocation6 + $0x2e8] sm:$0xff]  ;;  %v449_v25 = vpack.c.bf16 %v133_v19, %v127_v18  ;;  %v137_v28 = vld [vmem:[#allocation6 + $0x2a0] sm:$0xff] }
  0x3b   :  { %404 = vmatprep.subr.bf16.mxu0 %v403_v40  ;;  %v140_v22 = vld [vmem:[#allocation6 + $0x2b8] sm:$0xff]  ;;  %v419_v26 = vpack.c.bf16 %v144_v21, %v138_v20  ;;  %v143_v29 = vld [vmem:[#allocation6 + $0x2d0] sm:$0xff]  ;;  %v145_v31 = vld [vmem:[#allocation6 + $0x2e0] sm:$0xff] }
  0x3c   :  { %434 = vmatpush1.bf16.xpose.msra.mxu1 %v433_v39  ;;  %v451_v27 = vpack.c.bf16 %v146_v23, %v140_v22  ;;  %v139_v30 = vld [vmem:[#allocation6 + $0x2b0] sm:$0xff]  ;;  %v58_v32 = vld [vmem:[#allocation6 + $0x28] sm:$0xff]  ;;  %v64_v33 = vld [vmem:[#allocation6 + $0x58] sm:$0xff]  ;;  %v421_v34 = vpack.c.bf16 %v143_v29, %v137_v28 }
  0x3d   :  { %436 = vmatprep.subr.bf16.mxu1 %v435_v41  ;;  %v453_v35 = vpack.c.bf16 %v145_v31, %v139_v30  ;;  %v455_v36 = vpack.c.bf16 %v64_v33, %v58_v32  ;;  %v57_v37 = vld [vmem:[#allocation6 + $0x20] sm:$0xff]  ;;  %v63_v38 = vld [vmem:[#allocation6 + $0x50] sm:$0xff]  ;;  %v70_v39 = vld [vmem:[#allocation6 + $0x88] sm:$0xff] }
  0x3e   :  { %v76_v40 = vld [vmem:[#allocation6 + $0xb8] sm:$0xff]  ;;  %v47_v41 = vld [vmem:[#allocation3] sm:$0xff]  ;;  %v457_v42 = vpack.c.bf16 %v63_v38, %v57_v37  ;;  %v49_v43 = vld [vmem:[#allocation3 + $0x10] sm:$0xff] }
  0x3f   :  { %v459_v44 = vpack.c.bf16 %v76_v40, %v70_v39  ;;  %v52_v45 = vld [vmem:[#allocation3 + $0x28] sm:$0xff]  ;;  %v69_v46 = vld [vmem:[#allocation6 + $0x80] sm:$0xff]  ;;  %v75_v47 = vld [vmem:[#allocation6 + $0xb0] sm:$0xff] }
  0x40   :  { %v82_v48 = vld [vmem:[#allocation6 + $0xe8] sm:$0xff]  ;;  %v88_v49 = vld [vmem:[#allocation6 + $0x118] sm:$0xff]  ;;  %v461_v50 = vpack.c.bf16 %v75_v47, %v69_v46  ;;  %v93_v58 = vld [vmem:[#allocation6 + $0x140] sm:$0xff] }
  0x41   :  { %v463_v51 = vpack.c.bf16 %v88_v49, %v82_v48  ;;  %v99_v59 = vld [vmem:[#allocation6 + $0x170] sm:$0xff]  ;;  %v106_v60 = vld [vmem:[#allocation6 + $0x1a8] sm:$0xff]  ;;  %v112_v61 = vld [vmem:[#allocation6 + $0x1d8] sm:$0xff] }
  0x42   :  { %406 = vmatpush1.bf16.xpose.msra.mxu0 %v405_v52  ;;  %v81_v52 = vld [vmem:[#allocation6 + $0xe0] sm:$0xff]  ;;  %v469_v62 = vpack.c.bf16 %v99_v59, %v93_v58  ;;  %v471_v63 = vpack.c.bf16 %v112_v61, %v106_v60  ;;  %v123_v7 = vld [vmem:[#allocation6 + $0x230] sm:$0xff]  ;;  %v130_v8 = vld [vmem:[#allocation6 + $0x268] sm:$0xff] }
  0x43   :  { %408 = vmatprep.subr.bf16.mxu0 %v407_v54  ;;  %v94_v54 = vld [vmem:[#allocation6 + $0x148] sm:$0xff]  ;;  %v117_v6 = vld [vmem:[#allocation6 + $0x200] sm:$0xff]  ;;  %v136_v9 = vld [vmem:[#allocation6 + $0x298] sm:$0xff] }
  0x44   :  { %438 = vmatpush1.bf16.xpose.msra.mxu1 %v437_v53  ;;  %v87_v53 = vld [vmem:[#allocation6 + $0x110] sm:$0xff]  ;;  %v477_v10 = vpack.c.bf16 %v123_v7, %v117_v6  ;;  %v479_v11 = vpack.c.bf16 %v136_v9, %v130_v8  ;;  %v141_v18 = vld [vmem:[#allocation6 + $0x2c0] sm:$0xff] }
  0x45   :  { %440 = vmatprep.subr.bf16.mxu1 %v439_v55  ;;  %v100_v55 = vld [vmem:[#allocation6 + $0x178] sm:$0xff]  ;;  %v465_v56 = vpack.c.bf16 %v87_v53, %v81_v52  ;;  %v147_v19 = vld [vmem:[#allocation6 + $0x2f0] sm:$0xff] }
  0x46   :  { %v467_v57 = vpack.c.bf16 %v100_v55, %v94_v54  ;;  %v485_v20 = vpack.c.bf16 %v147_v19, %v141_v18  ;;  %v51_v21 = vld [vmem:[#allocation3 + $0x20] sm:$0xff] }
  0x47   :  { %v390_v28 = vld [vmem:[%s637_s2] ss:$0 sm:$0xff] }
  0x4a   :  { %410 = vmatpush1.bf16.xpose.msra.mxu0 %v409_v0  ;;  %v105_v0 = vld [vmem:[#allocation6 + $0x1a0] sm:$0xff] }
  0x4b   :  { %412 = vmatprep.subr.bf16.mxu0 %v411_v2  ;;  %v118_v2 = vld [vmem:[#allocation6 + $0x208] sm:$0xff] }
  0x4c   :  { %442 = vmatpush1.bf16.xpose.msra.mxu1 %v441_v1  ;;  %v111_v1 = vld [vmem:[#allocation6 + $0x1d0] sm:$0xff] }
  0x4d   :  { %444 = vmatprep.subr.bf16.mxu1 %v443_v3  ;;  %v124_v3 = vld [vmem:[#allocation6 + $0x238] sm:$0xff]  ;;  %v473_v4 = vpack.c.bf16 %v111_v1, %v105_v0 }
  0x4e   :  { %v475_v5 = vpack.c.bf16 %v124_v3, %v118_v2 }
  0x52   :  { %414 = vmatpush1.bf16.xpose.msra.mxu0 %v413_v12  ;;  %v129_v12 = vld [vmem:[#allocation6 + $0x260] sm:$0xff] }
  0x53   :  { %416 = vmatprep.subr.bf16.mxu0 %v415_v14  ;;  %v142_v14 = vld [vmem:[#allocation6 + $0x2c8] sm:$0xff] }
  0x54   :  { %446 = vmatpush1.bf16.xpose.msra.mxu1 %v445_v13  ;;  %v135_v13 = vld [vmem:[#allocation6 + $0x290] sm:$0xff] }
  0x55   :  { %448 = vmatprep.subr.bf16.mxu1 %v447_v15  ;;  %v148_v15 = vld [vmem:[#allocation6 + $0x2f8] sm:$0xff]  ;;  %v481_v16 = vpack.c.bf16 %v135_v13, %v129_v12 }
  0x56   :  { %v483_v17 = vpack.c.bf16 %v148_v15, %v142_v14 }
  0x5a   :  { %418 = vmatpush1.bf16.xpose.msra.mxu0 %v417_v24 }
  0x5b   :  { %420 = vmatprep.subr.bf16.mxu0 %v419_v26 }
  0x5c   :  { %450 = vmatpush1.bf16.xpose.msra.mxu1 %v449_v25 }
  0x5d   :  { %452 = vmatprep.subr.bf16.mxu1 %v451_v27 }
  0x62   :  { %422 = vmatpush1.bf16.xpose.msra.mxu0 %v421_v34 }
  0x63   :  { %456 = vmatprep.subr.bf16.mxu0 %v455_v36 }
  0x64   :  { %454 = vmatpush1.bf16.xpose.msra.mxu1 %v453_v35 }
  0x69   :  { %214 = vmatmul.mubr.f32.vlgmr.msra.gmra.mrb[0].mxu0 %v47_v41 }
  0x6a   :  { %458 = vmatpush1.bf16.xpose.msra.mxu0 %v457_v42  ;;  %353 = vmatprep.mubr.f32.mxu0 %v52_v45 }
  0x6b   :  { %284 = vmatmul.mubr.f32.vlgmr.msra.gmra.mrb[0].mxu1 %v49_v43  ;;  %460 = vmatprep.subr.bf16.mxu0 %v459_v44 }
  0x72   :  { %462 = vmatpush1.bf16.xpose.msra.mxu0 %v461_v50 }
  0x73   :  { %464 = vmatprep.subr.bf16.mxu0 %v463_v51 }
  0x7a   :  { %466 = vmatpush1.bf16.xpose.msra.mxu0 %v465_v56 }
  0x7b   :  { %468 = vmatprep.subr.bf16.mxu0 %v467_v57 }
  0x82   :  { %470 = vmatpush1.bf16.xpose.msra.mxu0 %v469_v62 }
  0x83   :  { %472 = vmatprep.subr.bf16.mxu0 %v471_v63 }
  0x8a   :  { %474 = vmatpush1.bf16.xpose.msra.mxu0 %v473_v4 }
  0x8b   :  { %476 = vmatprep.subr.bf16.mxu0 %v475_v5 }
  0x92   :  { %478 = vmatpush1.bf16.xpose.msra.mxu0 %v477_v10 }
  0x93   :  { %480 = vmatprep.subr.bf16.mxu0 %v479_v11 }
  0x9a   :  { %482 = vmatpush1.bf16.xpose.msra.mxu0 %v481_v16 }
  0x9b   :  { %484 = vmatprep.subr.bf16.mxu0 %v483_v17 }
  0xa2   :  { %486 = vmatpush1.bf16.xpose.msra.mxu0 %v485_v20 }
  0xa9   :  { %354 = vmatmul.mubr.f32.vlgmr.msra.gmra.mrb[2].mxu0 %v51_v21 }
 0x13c   :  { %v215_v22 = vpop.f32.mrb[0].mxu0 }
 0x13d   :  { %v217_v23 = vpop.f32.mrb[1].mxu0 }
 0x13e   :  { %v285_v24 = vpop.f32.mrb[0].mxu1 }
 0x13f   :  { %v286_v25 = vadd.f32 %v285_v24, %v215_v22  ;;  %v287_v26 = vpop.f32.mrb[1].mxu1 }
 0x17c   :  { %v355_v27 = vpop.f32.mrb[2].mxu0 }
 0x17d   :  { %v356_v29 = vadd.f32 %v355_v27, %v286_v25  ;;  %v357_v30 = vpop.f32.mrb[3].mxu0 }
 0x17f   :  { %v372_v31 = vadd.f32 %v390_v28, %v356_v29 }
 0x181   :  { %373 = vst [vmem:[#allocation8] sm:$0xff] %v372_v31 }
 0x182   :  { %547 = shalt.err (!%p544_p6)
}
 0x183   :  { %s548_s16 = scalar_lea.hbm %s638_s3, 128 }
 0x184   :  { %p549_p7 = scmp.ne.s32.totalorder %s638_s3, %s548_s16  ;;  %p552_p8 = scmp.lt.u32.totalorder %s548_s16, %s638_s3 }
 0x186   :  { %p554_p9 = pnand %p552_p8, %p549_p7 }
 0x188   :  { %557 = shalt.err (!%p554_p9)
}
 0x189   :  { %383 = dma.vmem_to_hbm [thread:$0]  %s381_s12, 128, %s638_s3, [#allocation5]  }
 0x18a   :  { %562 = dma.done.wait [#allocation5], 128  }
 0x18b   :  { %563 = vsyncadd [#allocation5], 4294967168 }
 0x18c   :  { %387 = vsyncpa [#allocation4], 1 }
 0x18d   :  { %388 = vsyncpa [#allocation7], 1 }
 0x18e   :  { %389 = vsyncpa [#allocation5], 1 }

</bundles_post_ra>
